<compile_context>
chip_gen: v7x
topology: tpu7x:2x2x1
jax: 0.10.0
libtpu: 0.0.40
codegen_flags: <defaults>
</compile_context>

<pallas_src>
import math

import jax
import jax.numpy as jnp
from jax import lax
from jax.experimental import pallas as pl
from jax.experimental.pallas import tpu as pltpu


NEG_BIAS = -1e30


# ----------------------------- Pallas kernel -----------------------------

def encoder_kernel(scal_ref, xz_ref, side_ref, o_ref):
    """One grid step == one pack of graphs (block-diagonal bias).
    Fused: layer_norm -> fused (dot + eig) score matmul -> masked softmax
    (additive-bias form) -> blend with precomputed motif attention (0.5 folded
    into V) -> A @ V."""
    y_scale = scal_ref[0]          # sqrt(1/sqrt(hidden_dim))   (>= 0)
    e_scale = scal_ref[1]          # sqrt(exp(lambda0))         (>= 0)

    d = o_ref.shape[-1]            # hidden_dim (static)
    r = o_ref.shape[-2]            # rows per pack (static)

    xz = xz_ref[...]               # (R, D + De) f32: [x | eigs]
    x = xz[:, :d]
    eigs = xz[:, d:]

    # F.layer_norm(x, (hidden_dim,)), no affine params, eps=1e-5
    mu = jnp.mean(x, axis=-1, keepdims=True)
    var = jnp.mean((x - mu) ** 2, axis=-1, keepdims=True)
    y = (x - mu) * lax.rsqrt(var + 1e-5)                  # (R, D); q = k = v = y

    # Fused score matmul: z = [y*y_scale | eigs*e_scale], s0 = z @ z.T  (single NT dot).
    # Exact fusion requires both scales >= 0 -- they are sqrt()'s by construction.
    z = jnp.concatenate([y * y_scale, eigs * e_scale], axis=-1)   # (R, D+De)
    z_bf = z.astype(jnp.bfloat16)                                  # MXU operands only
    s0 = lax.dot_general(
        z_bf, z_bf,
        dimension_numbers=(((1,), (1,)), ((), ())),
        preferred_element_type=jnp.float32)                        # (R, R) f32

    side = side_ref[...]            # (R, 2R) bf16: [additive bias | motif attn a1]
    bias = side[:, :r]              # 0 on edges, -1e30 off-edge / off-graph
    a1 = side[:, r:].astype(jnp.float32)

    s = s0 + bias                   # promoted to f32
    m = jnp.max(s, axis=-1, keepdims=True)
    p = jnp.exp(s - m)              # off-edge / off-graph entries underflow to 0
    denom = jnp.sum(p, axis=-1, keepdims=True)
    # Rows with no edges must produce a zero row (sparse_softmax semantics).
    row_valid = (jnp.max(bias, axis=-1, keepdims=True) > -1.0).astype(jnp.float32)
    a0 = p * (pl.reciprocal(denom, approx=True) * row_valid)       # dot/eig branch

    # blend = torch.stack([a0, a1], dim=1).mean(dim=1) == 0.5*(a0+a1); fold 0.5 into V.
    a = a0 + a1                                                    # (R, R) f32
    v_half = (0.5 * y).astype(jnp.bfloat16)                        # (R, D)
    o_ref[...] = jnp.dot(a.astype(jnp.bfloat16), v_half,
                         preferred_element_type=jnp.float32)


def encoder_pallas(scalars, xz, side, hidden_dim):
    """Packed over graphs: grid=(num_blocks,), one block-diagonal pack per step."""
    nb, r, dz = xz.shape

    grid_spec = pltpu.PrefetchScalarGridSpec(
        num_scalar_prefetch=1,            # `scalars` -> SMEM, first kernel ref
        grid=(nb,),
        in_specs=[
            pl.BlockSpec((pl.Squeezed(), r, dz),    lambda g, scal: (g, 0, 0)),  # [x|eigs]
            pl.BlockSpec((pl.Squeezed(), r, 2 * r), lambda g, scal: (g, 0, 0)),  # [bias|a1]
        ],
        out_specs=pl.BlockSpec((pl.Squeezed(), r, hidden_dim),
                               lambda g, scal: (g, 0, 0)),
    )

    return pl.pallas_call(
        encoder_kernel,
        out_shape=jax.ShapeDtypeStruct((nb, r, hidden_dim), jnp.float32),
        grid_spec=grid_spec,
        compiler_params=pltpu.CompilerParams(
            dimension_semantics=("parallel",)),
    )(scalars, xz, side)


# ------------------------------- JAX glue --------------------------------

def build_edge_side_inputs(indices_chunks, motif_adj_dense, motif_emb_weight,
                           motif_ids, gamma, num_nodes):
    """Reproduces the per-chunk Python loop of Attention.forward (per graph):
    cosine_similarity along the edge dimension (dim=0) per chunk, combined motif
    score per edge, scattered into dense (N, N) mask / motif-score matrices."""
    motif_embeds = motif_emb_weight[motif_ids]            # (N, 1) embedding lookup
    mask = jnp.zeros((num_nodes, num_nodes), jnp.float32)
    motif_scores = jnp.zeros((num_nodes, num_nodes), jnp.float32)
    eps = 1e-8
    for idx in indices_chunks:
        i0, i1 = idx[0], idx[1]                           # (E,), (E,)
        emb_i = motif_embeds[i0]                          # (E, 1)
        emb_j = motif_embeds[i1]                          # (E, 1)
        # F.cosine_similarity(emb_i, emb_j, dim=0) -> shape (1,)
        num = jnp.sum(emb_i * emb_j, axis=0)
        den = jnp.maximum(jnp.linalg.norm(emb_i, axis=0) *
                          jnp.linalg.norm(emb_j, axis=0), eps)
        sim = num / den                                   # (1,)
        motif_conn = motif_adj_dense[i0, i1]              # (E,)
        combined = motif_conn * gamma * sim               # (E,)
        mask = mask.at[i0, i1].set(1.0)
        motif_scores = motif_scores.at[i0, i1].set(combined)
    return mask, motif_scores


def masked_softmax(scores, mask):
    """sparse_softmax over the edges of each row, dense-masked formulation
    (rows with no edges -> zero row).  Used for the precomputed motif branch
    and for the f32 reference."""
    s = jnp.where(mask > 0, scores, NEG_BIAS)
    p = jnp.exp(s - jnp.max(s, axis=-1, keepdims=True)) * mask
    d = jnp.sum(p, axis=-1, keepdims=True)
    return p / jnp.where(d == 0.0, 1.0, d)


def block_diag_pack(per_graph, fill):
    """(G, N, N) per-graph blocks -> (G*N, G*N) block-diagonal with `fill` off-graph."""
    g, n, _ = per_graph.shape
    out = jnp.full((g * n, g * n), fill, per_graph.dtype)
    for i in range(g):
        out = out.at[i * n:(i + 1) * n, i * n:(i + 1) * n].set(per_graph[i])
    return out


# ------------------------------ reference --------------------------------

def reference_forward(x, eigs, mask, motif_scores, exp_lambda0, sqrt_dim):
    mu = jnp.mean(x, axis=-1, keepdims=True)
    var = jnp.mean((x - mu) ** 2, axis=-1, keepdims=True)
    y = (x - mu) / jnp.sqrt(var + 1e-5)
    s0 = (y @ y.T) * sqrt_dim + exp_lambda0 * (eigs @ eigs.T)
    a = 0.5 * (masked_softmax(s0, mask) + masked_softmax(motif_scores, mask))
    return a @ y


# --------------------------------- main -----------------------------------

if __name__ == "__main__":
    # args
    B = 8             # number of graphs
    N = 8             # nodes per graph
    HIDDEN_DIM = 32   # args.hidden_dim
    EIGS_DIM = 8      # args.eigs_dim
    NUM_MOTIFS = 5    # args.num_motifs
    NUM_BLOCKS = 2    # packs (2 -> one fat step per v7x TensorCore)
    GPB = B // NUM_BLOCKS
    R = GPB * N       # rows per pack (= 32)

    key = jax.random.PRNGKey(0)
    kx, ke, ka, km = jax.random.split(key, 4)

    x = jax.random.normal(kx, (B, N, HIDDEN_DIM), jnp.float32)
    eigs = jax.random.normal(ke, (B, N, EIGS_DIM), jnp.float32)
    motif_adj_dense = jax.random.uniform(ka, (B, N, N), jnp.float32)   # dense motif adjacency
    motif_ids = jax.random.randint(km, (B, N), 0, NUM_MOTIFS)

    # two duplicate-free edge chunks (as the PyTorch `indices` list of 2xE tensors)
    rows = jnp.arange(N, dtype=jnp.int32)
    indices_chunks = [
        jnp.stack([rows, (rows + 1) % N]),   # (2, N)
        jnp.stack([rows, (rows + 2) % N]),   # (2, N)
    ]

    # deterministic parameter init, exactly as in Attention.__init__
    lambda0 = jnp.zeros((1,), jnp.float32)
    gamma = jnp.zeros((1,), jnp.float32)
    motif_emb_weight = jnp.ones((NUM_MOTIFS, 1), jnp.float32)
    sqrt_dim = 1.0 / math.sqrt(float(HIDDEN_DIM))
    exp_lambda0 = float(jnp.exp(lambda0)[0])
    # sqrt_eig is defined in __init__ but unused in forward.

    # per-graph dense side inputs (glue mirrors the per-chunk loop in the PyTorch forward)
    masks, motifs = [], []
    for g in range(B):
        m, ms = build_edge_side_inputs(indices_chunks, motif_adj_dense[g],
                                       motif_emb_weight, motif_ids[g], gamma, N)
        masks.append(m)
        motifs.append(ms)
    mask = jnp.stack(masks)                         # (B, N, N) {0,1}
    motif_scores = jnp.stack(motifs)                # (B, N, N)

    bias_g = jnp.where(mask > 0, 0.0, NEG_BIAS)     # (B, N, N) additive bias per graph
    a1_g = masked_softmax(motif_scores, mask)       # (B, N, N) precomputed motif branch

    # block-diagonal packs: [bias | a1] merged into one bf16 side input per pack
    side_blocks = []
    for b in range(NUM_BLOCKS):
        bias_bd = block_diag_pack(bias_g[b * GPB:(b + 1) * GPB], NEG_BIAS)   # (R, R)
        a1_bd = block_diag_pack(a1_g[b * GPB:(b + 1) * GPB], 0.0)            # (R, R)
        side_blocks.append(jnp.concatenate([bias_bd, a1_bd], axis=-1))       # (R, 2R)
    side = jnp.stack(side_blocks).astype(jnp.bfloat16)                       # (NB, R, 2R)

    # node features packed: [x | eigs] per row, reshaped into packs -> one DMA per step
    xz = jnp.concatenate([x, eigs], axis=-1).reshape(
        NUM_BLOCKS, R, HIDDEN_DIM + EIGS_DIM)                                # (NB, R, 40)

    # sqrt'd scalars for the fused concat-matmul trick (both non-negative)
    scalars = jnp.array([math.sqrt(sqrt_dim), math.sqrt(exp_lambda0)], jnp.float32)

    out_packed = encoder_pallas(scalars, xz, side, HIDDEN_DIM)
    out_packed = jax.block_until_ready(out_packed)
    out = out_packed.reshape(B, N, HIDDEN_DIM)

    ref = jax.vmap(lambda xx, ee, mm, ss: reference_forward(
        xx, ee, mm, ss, exp_lambda0, sqrt_dim))(x, eigs, mask, motif_scores)

    assert out.shape == (B, N, HIDDEN_DIM)
    # bf16 MXU inputs loosen the tolerance vs. the pure-f32 reference (expected per review)
    max_err = float(jnp.max(jnp.abs(out - ref)))
    assert max_err < 1e-1, f"mismatch vs reference: max_err={max_err}"

    print("KERNEL_OK")
</pallas_src>

<mosaic_0001>
module attributes {stable_mosaic.version = 11 : i64} {
  func.func @encoder_kernel(%arg0: i32, %arg1: memref<2xf32, #tpu.memory_space<smem>>, %arg2: memref<1x32x40xf32, #tpu.memory_space<vmem>>, %arg3: memref<1x32x64xbf16, #tpu.memory_space<vmem>>, %arg4: memref<1x32x32xf32, #tpu.memory_space<vmem>>) attributes {dimension_semantics = [#tpu.dimension_semantics<parallel>], iteration_bounds = array<i64: 2>, scalar_prefetch = 1 : i64, scratch_operands = 0 : i64, tpu.core_type = #tpu.core_type<tc>, window_params = [{transform_indices = @transform_0, window_bounds = array<i64: 1, 32, 40>}, {transform_indices = @transform_1, window_bounds = array<i64: 1, 32, 64>}, {transform_indices = @transform_2, window_bounds = array<i64: 1, 32, 32>}]} {
    %c0 = arith.constant 0 : index
    %0 = memref.load %arg1[%c0] : memref<2xf32, #tpu.memory_space<smem>>
    %c1 = arith.constant 1 : index
    %1 = memref.load %arg1[%c1] : memref<2xf32, #tpu.memory_space<smem>>
    %c0_0 = arith.constant 0 : index
    %c0_1 = arith.constant 0 : index
    %c0_2 = arith.constant 0 : index
    %2 = vector.load %arg2[%c0_0, %c0_1, %c0_2] : memref<1x32x40xf32, #tpu.memory_space<vmem>>, vector<1x32x40xf32>
    %3 = vector.shape_cast %2 : vector<1x32x40xf32> to vector<32x40xf32>
    %4 = vector.extract_strided_slice %3 {offsets = [0, 0], sizes = [32, 32], strides = [1, 1]} : vector<32x40xf32> to vector<32x32xf32>
    %5 = vector.extract_strided_slice %3 {offsets = [0, 32], sizes = [32, 8], strides = [1, 1]} : vector<32x40xf32> to vector<32x8xf32>
    %cst = arith.constant dense<0.000000e+00> : vector<32xf32>
    %6 = vector.multi_reduction <add>, %4, %cst [1] : vector<32x32xf32> to vector<32xf32>
    %7 = vector.shape_cast %6 : vector<32xf32> to vector<32x1xf32>
    %cst_3 = arith.constant 3.200000e+01 : f32
    %8 = vector.broadcast %cst_3 : f32 to vector<32x1xf32>
    %9 = arith.divf %7, %8 : vector<32x1xf32>
    %10 = vector.broadcast %9 : vector<32x1xf32> to vector<32x32xf32>
    %11 = arith.subf %4, %10 : vector<32x32xf32>
    %12 = arith.mulf %11, %11 : vector<32x32xf32>
    %cst_4 = arith.constant dense<0.000000e+00> : vector<32xf32>
    %13 = vector.multi_reduction <add>, %12, %cst_4 [1] : vector<32x32xf32> to vector<32xf32>
    %14 = vector.shape_cast %13 : vector<32xf32> to vector<32x1xf32>
    %cst_5 = arith.constant 3.200000e+01 : f32
    %15 = vector.broadcast %cst_5 : f32 to vector<32x1xf32>
    %16 = arith.divf %14, %15 : vector<32x1xf32>
    %17 = vector.broadcast %9 : vector<32x1xf32> to vector<32x32xf32>
    %18 = arith.subf %4, %17 : vector<32x32xf32>
    %cst_6 = arith.constant 9.99999974E-6 : f32
    %19 = vector.broadcast %cst_6 : f32 to vector<32x1xf32>
    %20 = arith.addf %16, %19 : vector<32x1xf32>
    %21 = math.rsqrt %20 : vector<32x1xf32>
    %22 = vector.broadcast %21 : vector<32x1xf32> to vector<32x32xf32>
    %23 = arith.mulf %18, %22 : vector<32x32xf32>
    %24 = vector.broadcast %0 : f32 to vector<32x32xf32>
    %25 = arith.mulf %23, %24 : vector<32x32xf32>
    %26 = vector.broadcast %1 : f32 to vector<32x8xf32>
    %27 = arith.mulf %5, %26 : vector<32x8xf32>
    %28 = tpu.concatenate %25, %27 in 1 : vector<32x32xf32>, vector<32x8xf32> -> vector<32x40xf32>
    %29 = arith.truncf %28 : vector<32x40xf32> to vector<32x40xbf16>
    %cst_7 = arith.constant dense<0.000000e+00> : vector<32x32xf32>
    %30 = tpu.matmul %29, %29, %cst_7 {dimension_numbers = #tpu.dot_dimension_numbers<[1], [1], [0], [0], [0, 0, 1, 0], [], []>} : vector<32x40xbf16>, vector<32x40xbf16>, vector<32x32xf32> -> vector<32x32xf32>
    %c0_8 = arith.constant 0 : index
    %c0_9 = arith.constant 0 : index
    %c0_10 = arith.constant 0 : index
    %31 = vector.load %arg3[%c0_8, %c0_9, %c0_10] : memref<1x32x64xbf16, #tpu.memory_space<vmem>>, vector<1x32x64xbf16>
    %32 = vector.shape_cast %31 : vector<1x32x64xbf16> to vector<32x64xbf16>
    %33 = vector.extract_strided_slice %32 {offsets = [0, 0], sizes = [32, 32], strides = [1, 1]} : vector<32x64xbf16> to vector<32x32xbf16>
    %34 = vector.extract_strided_slice %32 {offsets = [0, 32], sizes = [32, 32], strides = [1, 1]} : vector<32x64xbf16> to vector<32x32xbf16>
    %35 = arith.extf %34 : vector<32x32xbf16> to vector<32x32xf32>
    %36 = arith.extf %33 : vector<32x32xbf16> to vector<32x32xf32>
    %37 = arith.addf %30, %36 : vector<32x32xf32>
    %cst_11 = arith.constant dense<0xFF800000> : vector<32xf32>
    %38 = vector.multi_reduction <maximumf>, %37, %cst_11 [1] : vector<32x32xf32> to vector<32xf32>
    %39 = vector.shape_cast %38 : vector<32xf32> to vector<32x1xf32>
    %40 = vector.broadcast %39 : vector<32x1xf32> to vector<32x32xf32>
    %41 = arith.subf %37, %40 : vector<32x32xf32>
    %42 = math.exp %41 : vector<32x32xf32>
    %cst_12 = arith.constant dense<0.000000e+00> : vector<32xf32>
    %43 = vector.multi_reduction <add>, %42, %cst_12 [1] : vector<32x32xf32> to vector<32xf32>
    %44 = vector.shape_cast %43 : vector<32xf32> to vector<32x1xf32>
    %cst_13 = arith.constant dense<0xFF80> : vector<32xbf16>
    %45 = vector.multi_reduction <maximumf>, %33, %cst_13 [1] : vector<32x32xbf16> to vector<32xbf16>
    %46 = vector.shape_cast %45 : vector<32xbf16> to vector<32x1xbf16>
    %cst_14 = arith.constant -1.000000e+00 : bf16
    %47 = vector.broadcast %cst_14 : bf16 to vector<32x1xbf16>
    %48 = arith.cmpf ogt, %46, %47 : vector<32x1xbf16>
    %49 = arith.extui %48 : vector<32x1xi1> to vector<32x1xi32>
    %50 = arith.sitofp %49 : vector<32x1xi32> to vector<32x1xf32>
    %51 = tpu.reciprocal %44 {approx = true} : vector<32x1xf32> -> vector<32x1xf32>
    %52 = arith.mulf %51, %50 : vector<32x1xf32>
    %53 = vector.broadcast %52 : vector<32x1xf32> to vector<32x32xf32>
    %54 = arith.mulf %42, %53 : vector<32x32xf32>
    %55 = arith.addf %54, %35 : vector<32x32xf32>
    %cst_15 = arith.constant 5.000000e-01 : f32
    %56 = vector.broadcast %cst_15 : f32 to vector<32x32xf32>
    %57 = arith.mulf %56, %23 : vector<32x32xf32>
    %58 = arith.truncf %57 : vector<32x32xf32> to vector<32x32xbf16>
    %59 = arith.truncf %55 : vector<32x32xf32> to vector<32x32xbf16>
    %cst_16 = arith.constant dense<0.000000e+00> : vector<32x32xf32>
    %60 = tpu.matmul %59, %58, %cst_16 {dimension_numbers = #tpu.dot_dimension_numbers<[1], [0], [0], [1], [0, 0, 1, 1], [], []>} : vector<32x32xbf16>, vector<32x32xbf16>, vector<32x32xf32> -> vector<32x32xf32>
    %c0_17 = arith.constant 0 : index
    %c0_18 = arith.constant 0 : index
    %c0_19 = arith.constant 0 : index
    %61 = vector.load %arg4[%c0_17, %c0_18, %c0_19] : memref<1x32x32xf32, #tpu.memory_space<vmem>>, vector<1x32x32xf32>
    %62 = vector.shape_cast %61 : vector<1x32x32xf32> to vector<32x32xf32>
    %63 = vector.shape_cast %60 : vector<32x32xf32> to vector<1x32x32xf32>
    tpu.vector_store %arg4[%c0_17, %c0_18, %c0_19], %63 {strides = array<i32>} : memref<1x32x32xf32, #tpu.memory_space<vmem>>, vector<1x32x32xf32>,
    return
  }
  func.func @transform_0(%arg0: i32, %arg1: memref<2xf32, #tpu.memory_space<smem>>) -> (i32, i32, i32) {
    %c0_i32 = arith.constant 0 : i32
    %c0_i32_0 = arith.constant 0 : i32
    %c0_i32_1 = arith.constant 0 : i32
    return %arg0, %c0_i32, %c0_i32_0 : i32, i32, i32
  }
  func.func @transform_1(%arg0: i32, %arg1: memref<2xf32, #tpu.memory_space<smem>>) -> (i32, i32, i32) {
    %c0_i32 = arith.constant 0 : i32
    %c0_i32_0 = arith.constant 0 : i32
    %c0_i32_1 = arith.constant 0 : i32
    return %arg0, %c0_i32, %c0_i32_0 : i32, i32, i32
  }
  func.func @transform_2(%arg0: i32, %arg1: memref<2xf32, #tpu.memory_space<smem>>) -> (i32, i32, i32) {
    %c0_i32 = arith.constant 0 : i32
    %c0_i32_0 = arith.constant 0 : i32
    %c0_i32_1 = arith.constant 0 : i32
    return %arg0, %c0_i32, %c0_i32_0 : i32, i32, i32
  }
}

</mosaic_0001>

<bundles_post_ra>
// kernel: tpu_custom_call.1
= control target key start
LH: loop header
LB: loop body
LE: loop exit
PB: predicated region body
PF: predicated region fallthrough
CT: control target
= control target key end

     0   :  { %s1364_s0 = inlined_call_operand.hbm [shape: f32[2], index: 0, kind: input, shape index: {}]   ;;  %s1365_s1 = inlined_call_operand.hbm [shape: f32[2,32,40], index: 1, kind: input, shape index: {}]   ;;  %s1366_s2 = inlined_call_operand.hbm [shape: bf16[2,32,64], index: 2, kind: input, shape index: {}]   ;;  %s1367_s3 = inlined_call_operand.hbm [shape: f32[2,32,32], index: 3, kind: output, shape index: {}]  }
   0x1   :  { %s859_s14 = scalar_lea.hbm %s1364_s0, 16 }
   0x2   :  { %p860_p0 = scmp.ne.s32.totalorder %s1364_s0, %s859_s14  ;;  %p863_p1 = scmp.lt.u32.totalorder %s859_s14, %s1364_s0 }
   0x4   :  { %p865_p2 = pnand %p863_p1, %p860_p0 }
   0x6   :  { %868 = shalt.err (!%p865_p2)  }
   0x7   :  { %s1003_s19 = smov [#allocation3]  }
   0x8   :  { %9 = dma.hbm_to_smem %s1364_s0, 16, %s1003_s19, [#allocation2] }
   0x9   :  { %973 = dma.done.wait [#allocation2], 16 }
   0xa   :  { %974 = vsyncadd [#allocation2], 4294967280 }
   0xb   :  { %11 = sfence }
   0xc   :  { %12 = vsyncpa [#allocation5], 0 }
   0xd   :  { %14 = vsyncpa [#allocation5 + $0x1], 0 }
   0xe   :  { %15 = vsyncpa [#allocation8], 0 }
   0xf   :  { %17 = vsyncpa [#allocation8 + $0x1], 0 }
  0x10   :  { %18 = vsyncpa [#allocation6], 0 }
  0x11   :  { %20 = vsyncpa [#allocation6 + $0x1], 0  ;;  %s1050_s22 = smov 0   ;;  %s1052_s23 = smov 0  }
  0x12   :  { %s1054_s24 = smov 0   ;;  %s1056_s25 = smov 0  }
  0x13 LB: > { %s1071_s0 = sadd.s32 4294967295, %s1001_s25   ;;  %s694_s26 = sadd.s32 4294967294, %s1001_s25   ;;  %s1001_s25 = sphi %s1056_s25, %s1383_s25   ;;  %s997_s24 = sphi %s1054_s24, %s1382_s24   ;;  %s993_s23 = sphi %s1052_s23, %s1381_s23   ;;  %s989_s22 = sphi %s1050_s22, %s1380_s22  }
  0x14   : > { %s1075_s27 = sadd.s32 1, %s1001_s25   ;;  %s33_s28 = sadd.s32 1, %s997_s24 }
  0x15   : > { %s30_s29 = ssub.s32 %s1001_s25, %s1075_s27  ;;  %p40_p3 = scmp.ne.s32.totalorder %s997_s24, %s993_s23 }
  0x16   : > { %p31_p4 = scmp.eq.s32.totalorder %s30_s29, 0  ;;  %p41_p5 = scmp.eq.s32.totalorder %s1001_s25, 0 }
  0x17   : > { %p46_p6 = scmp.ne.s32.totalorder %s993_s23, %s989_s22  ;;  %p47_p7 = scmp.eq.s32.totalorder %s1071_s0, 0 }
  0x18   : > { %s1087_s30 = scalar_select %p31_p4, %s997_s24, %s33_s28  }
  0x19   : > { %p1089_p8 = por %p41_p5, %p40_p3  ;;  %p1093_p9 = por %p47_p7, %p46_p6 }
  0x1a   : > { %p96_p10 = scmp.eq.s32.totalorder %s1071_s0, 1  ;;  %p102_p11 = scmp.eq.s32.totalorder %s694_s26, 1 }
  0x1b   : > { %s1371_s5 = scalar_select %p1093_p9, 1, 0 }
  0x1c   : > { %p769_p13 = scmp.lt.s32.totalorder %s1001_s25, 2  ;;  %p1100_p0 = por %p96_p10, %p40_p3 }
  0x1d   : > { %p1104_p1 = por %p102_p11, %p46_p6  ;;  %s1109_s8 = sand.u32 1, %s997_s24  }
  0x1e   : > { %s1372_s6 = scalar_select %p1100_p0, 1, 0 }
  0x1f   : > { %s1373_s7 = scalar_select %p1104_p1, 1, 0 }
  0x20   : > { %s723_s9 = sshll.u32 %s1001_s25, 9  ;;  %s697_s10 = sshll.u32 %s1109_s8, 5 }
  0x21   : > { %s1116_s13 = scalar_lea.hbm %s1365_s1, %s723_s9  ;;  %s126_s14 = scalar_lea.vmem [#allocation4], %s697_s10 }
  0x22   : > { %s133_s15 = sshll.u32 %s126_s14, 4  ;;  %p1120_p2 = pnand %p769_p13, %p1089_p8  ;;  %s1124_s15 = int_to_ptr.vmem [resolvable:$true] %s133_s15 }
  0x23   : > { %s123_s17 = scalar_lea.sflag [#allocation5], %s1109_s8  ;;  %s869_s18 = scalar_lea.hbm %s1116_s13, 512 }
  0x24   : > { %p870_p3 = scmp.ne.s32.totalorder %s1116_s13, %s869_s18  ;;  %p871_p4 = pneg %p1120_p2 }
  0x25   : > { %s874_s21 = scalar_lea.hbm %s1365_s1, 1024  ;;  %p875_p7 = scmp.lt.u32.totalorder %s1116_s13, %s1365_s1 }
  0x26   : > { %p872_p5 = pnand %p871_p4, %p870_p3  ;;  %p876_p8 = scmp.lt.u32.totalorder %s874_s21, %s869_s18 }
  0x27   : > { %p878_p11 = scmp.lt.u32.totalorder %s869_s18, %s1116_s13 }
  0x28   : > { %p873_p6 = pneg %p872_p5  ;;  %p877_p10 = por %p876_p8, %p875_p7 }
  0x2a   : > { %p879_p13 = por %p878_p11, %p877_p10 }
  0x2c   : > { %p880_p12 = pnand %p879_p13, %p873_p6 }
  0x2e   : > { %883 = shalt.err (!%p880_p12)
}
  0x2f   : > { %s884_s29 = scalar_lea.vmem %s1124_s15, 512  ;;  %s1004_s4 = smov [#allocation4]  }
  0x30   : > { %p885_p3 = scmp.ne.s32.totalorder %s1124_s15, %s884_s29  ;;  %s889_s9 = sshll.u32 %s1004_s4, 4  ;;  %s890_s9 = int_to_ptr.vmem [resolvable:$false] %s889_s9 }
  0x31   : > { %s891_s10 = scalar_lea.vmem %s890_s9, 1024  ;;  %p892_p0 = scmp.lt.s32.totalorder %s1124_s15, %s890_s9 }
  0x32   : > { %p887_p5 = pnand %p885_p3, %p871_p4  ;;  %p893_p7 = scmp.lt.s32.totalorder %s891_s10, %s884_s29 }
  0x34   : > { %p888_p1 = pneg %p887_p5  ;;  %p894_p8 = por %p893_p7, %p892_p0 }
  0x36   : > { %p895_p10 = pnand %p894_p8, %p888_p1 }
  0x38   : > { %898 = shalt.err (!%p895_p10)
}
  0x39   : > { %s1005_s11 = smov 128   ;;  %s1006_s12 = smov 8  }
  0x3a   : > { %761 = dma.hbm_to_vmem [thread:$0]  (!%p1120_p2), %s1116_s13, 512, %s1124_s15, %s123_s17, %s1005_s11, %s1005_s11, %s1006_s12  }
  0x3b   : > { %p703_p12 = scmp.ge.s32.totalorder %s1001_s25, 1  ;;  %p162_p6 = scmp.lt.s32.totalorder %s1001_s25, 3 }
  0x3c   : > { %s700_s14 = sshll.u32 %s1109_s8, 4  ;;  %s724_s19 = sshll.u32 %s1001_s25, 8 }
  0x3d   : > { %p1157_p0 = pnand %p703_p12, %p162_p6  ;;  %s147_s20 = scalar_lea.vmem [#allocation7], %s700_s14 }
  0x3e   : > { %s154_s21 = sshll.u32 %s147_s20, 4  ;;  %s1165_s29 = scalar_lea.hbm %s1366_s2, %s724_s19  ;;  %s1167_s21 = int_to_ptr.vmem [resolvable:$true] %s154_s21 }
  0x3f   : > { %s144_s13 = scalar_lea.sflag [#allocation8], %s1109_s8  ;;  %s899_s15 = scalar_lea.hbm %s1165_s29, 256 }
  0x40   : > { %p900_p1 = scmp.ne.s32.totalorder %s1165_s29, %s899_s15  ;;  %s904_s9 = scalar_lea.hbm %s1366_s2, 512 }
  0x41   : > { %p905_p3 = scmp.lt.u32.totalorder %s1165_s29, %s1366_s2  ;;  %p906_p5 = scmp.lt.u32.totalorder %s904_s9, %s899_s15 }
  0x42   : > { %p902_p11 = pnand %p900_p1, %p871_p4  ;;  %p908_p8 = scmp.lt.u32.totalorder %s899_s15, %s1165_s29 }
  0x43   : > { %p907_p7 = por %p906_p5, %p905_p3 }
  0x44   : > { %p903_p13 = pneg %p902_p11 }
  0x45   : > { %p909_p10 = por %p908_p8, %p907_p7 }
  0x47   : > { %p910_p12 = pnand %p909_p10, %p903_p13 }
  0x49   : > { %913 = shalt.err (!%p910_p12)
}
  0x4a   : > { %s914_s12 = scalar_lea.vmem %s1167_s21, 256  ;;  %s1007_s14 = smov [#allocation7]  }
  0x4b   : > { %p915_p6 = scmp.ne.s32.totalorder %s1167_s21, %s914_s12  ;;  %s919_s19 = sshll.u32 %s1007_s14, 4  ;;  %s920_s19 = int_to_ptr.vmem [resolvable:$false] %s919_s19 }
  0x4c   : > { %s921_s20 = scalar_lea.vmem %s920_s19, 512  ;;  %p922_p9 = scmp.lt.s32.totalorder %s1167_s21, %s920_s19 }
  0x4d   : > { %p917_p1 = pnand %p915_p6, %p871_p4  ;;  %p923_p3 = scmp.lt.s32.totalorder %s921_s20, %s914_s12 }
  0x4f   : > { %p918_p11 = pneg %p917_p1  ;;  %p924_p5 = por %p923_p3, %p922_p9 }
  0x51   : > { %p925_p7 = pnand %p924_p5, %p918_p11 }
  0x53   : > { %928 = shalt.err (!%p925_p7)
}
  0x54   : > { %s1008_s26 = smov 64   ;;  %s1009_s28 = smov 4  }
  0x55   : > { %764 = dma.hbm_to_vmem [thread:$0]  (!%p1120_p2), %s1165_s29, 256, %s1167_s21, %s144_s13, %s1008_s26, %s1008_s26, %s1009_s28  }
  0x56   : > { %166 = sbr.rel (%p1157_p0) target bundleno = 1343 (0x53f), region = 28  ;;  %s1198_s15 = sand.u32 (!%p1157_p0), 1, %s993_s23  }
  0x57   : > { %s704_s17 = sshll.u32 (!%p1157_p0), %s1198_s15, 5  ;;  %s169_s4 = scalar_lea.sflag (!%p1157_p0), [#allocation5], %s1198_s15 }
  0x58   : > { %s172_s9 = scalar_lea.vmem (!%p1157_p0), [#allocation4], %s704_s17  ;;  %p1376_p9 = scmp.ne.s32.totalorder (!%p1157_p0), %s1371_s5, 0 }
  0x5d   : > { %976 = dma.done.wait (%p1376_p9), %s169_s4, 512  }
  0x5e   : > { %978 = vsyncadd (%p1376_p9), %s169_s4, 4294966784  ;;  %s705_s8 = sshll.u32 %s1198_s15, 4  ;;  %s178_s16 = scalar_lea.sflag [#allocation8], %s1198_s15 }
  0x5f   : > { %s1210_s18 = scalar_lea.vmem [#allocation7], %s705_s8 }
  0x60   : > { %980 = dma.done.wait (%p1376_p9), %s178_s16, 256  }
  0x61   : > { %982 = vsyncadd (%p1376_p9), %s178_s16, 4294967040  ;;  %vm218_vm0 = vcmask 261120   ;;  %v214_v0 = vld [vmem:[%s172_s9] sm:$0xff]  ;;  %v1216_v1 = vld [vmem:[%s172_s9 + $0x10] sm:$0xff]  ;;  %s707_s5 = sld [smem:[#allocation3 + $0x1]]  ;;  %s212_s21 = sld [smem:[#allocation3]] }
  0x62   : > { %v215_v2 = vld [vmem:[%s172_s9 + $0x8] sm:$0xff]  ;;  %v219_v3 = vsel %vm218_vm0, %v214_v0, 0.0  ;;  %v225_v4 = vsel %vm218_vm0, %v1216_v1, 0.0  ;;  %v1221_v5 = vld [vmem:[%s172_s9 + $0x18] sm:$0xff]  ;;  %vm296_vm1 = vcmask 326656   ;;  %s1014_s29 = smov 96  }
  0x63   : > { %220 = vadd.xlane.f32.xlu0 %v219_v3  ;;  %226 = vadd.xlane.f32.xlu1 %v225_v4  ;;  %v222_v6 = vsel %vm218_vm0, %v215_v2, 0.0  ;;  %v228_v7 = vsel %vm218_vm0, %v1221_v5, 0.0  ;;  %s206_s13 = scalar_lea.vmem [#allocation9], %s704_s17  ;;  %s725_s11 = sshll.u32 %s1071_s0, 9 }
  0x64   : > { %s598_s10 = sshll.u32 %s206_s13, 4  ;;  %s1317_s19 = scalar_lea.hbm %s1367_s3, %s725_s11  ;;  %s1311_s10 = int_to_ptr.vmem [resolvable:$true] %s598_s10 }
  0x65   : > { %s585_s0 = scalar_lea.sflag [#allocation6], %s1198_s15  ;;  %s929_s20 = scalar_lea.vmem %s1311_s10, 512 }
  0x66   : > { %p930_p2 = scmp.ne.s32.totalorder %s1311_s10, %s929_s20  ;;  %p1377_p4 = scmp.ne.s32.totalorder %s1372_s6, 0 }
  0x67   : > { %223 = vadd.xlane.f32.xlu0 %v222_v6  ;;  %229 = vadd.xlane.f32.xlu1 %v228_v7  ;;  %v277_v41 = vstv %s707_s5  ;;  %v272_v43 = vstv %s212_s21  ;;  %s1015_s26 = smov [#allocation9]  }
  0x68   : > { %v278_v45 = vmul.f32 %v277_v41, %v214_v0  ;;  %v279_v48 = vmul.f32 %v277_v41, %v215_v2  ;;  %v280_v55 = vmul.f32 %v277_v41, %v1216_v1  ;;  %v281_v56 = vmul.f32 %v277_v41, %v1221_v5  ;;  %p931_p0 = pnand %p930_p2, %p1377_p4  ;;  %s933_s28 = sshll.u32 %s1015_s26, 4  ;;  %s934_s28 = int_to_ptr.vmem [resolvable:$false] %s933_s28 }
  0x69   : > { %s935_s17 = scalar_lea.vmem %s934_s28, 1024  ;;  %p936_p8 = scmp.lt.s32.totalorder %s1311_s10, %s934_s28 }
  0x6a   : > { %p932_p13 = pneg %p931_p0  ;;  %p937_p10 = scmp.lt.s32.totalorder %s935_s17, %s929_s20 }
  0x6c   : > { %p938_p12 = por %p937_p10, %p936_p8 }
  0x6e   : > { %p939_p6 = pnand %p938_p12, %p932_p13 }
  0xf0   : > { %v221_v8 = vpop.xlane.xlu0 %220  ;;  %v227_v9 = vpop.xlane.xlu1 %226 }
  0xf1   : > { %v232_v10 = vmul.f32 0.03125, %v221_v8  ;;  %v234_v11 = vmul.f32 0.03125, %v227_v9  ;;  %v1245_v8 = vld [vmem:[%s1210_s18] sm:$0xff]   ;;  %v1248_v9 = vld [vmem:[%s1210_s18 + $0x8] sm:$0xff]  }
  0xf3   : > { %v236_v12 = vsub.f32 %v214_v0, %v232_v10  ;;  %v238_v13 = vsub.f32 %v1216_v1, %v234_v11  ;;  %v292_v10 = vunpack.c.l.bf16 %v1245_v8  ;;  %v294_v11 = vunpack.c.l.bf16 %v1248_v9 }
  0xf4   : > { %v224_v14 = vpop.xlane.xlu0 %223  ;;  %v230_v15 = vpop.xlane.xlu1 %229 }
  0xf5   : > { %v233_v16 = vmul.f32 0.03125, %v224_v14  ;;  %v235_v17 = vmul.f32 0.03125, %v230_v15  ;;  %v240_v18 = vmul.f32 %v236_v12, %v236_v12  ;;  %v242_v19 = vmul.f32 %v238_v13, %v238_v13 }
  0xf7   : > { %v237_v20 = vsub.f32 %v215_v2, %v233_v16  ;;  %v239_v21 = vsub.f32 %v1221_v5, %v235_v17  ;;  %v244_v22 = vsel %vm218_vm0, %v240_v18, 0.0  ;;  %v250_v23 = vsel %vm218_vm0, %v242_v19, 0.0 }
  0xf8   : > { %245 = vadd.xlane.f32.xlu0 %v244_v22  ;;  %v295_v16 = vunpack.c.h.bf16 %v1248_v9 }
  0xf9   : > { %v241_v24 = vmul.f32 %v237_v20, %v237_v20  ;;  %v243_v25 = vmul.f32 %v239_v21, %v239_v21 }
  0xfb   : > { %v247_v26 = vsel %vm218_vm0, %v241_v24, 0.0  ;;  %v253_v27 = vsel %vm218_vm0, %v243_v25, 0.0 }
  0xfc   : > { %251 = vadd.xlane.f32.xlu0 %v250_v23  ;;  %248 = vadd.xlane.f32.xlu1 %v247_v26  ;;  %v405_v26 = vsel %vm218_vm0, %v1248_v9, 4286644096 }
 0x100   : > { %254 = vadd.xlane.f32.xlu1 %v253_v27  ;;  %v400_v27 = vsel %vm218_vm0, %v1245_v8, 4286644096 }
 0x185   : > { %v246_v28 = vpop.xlane.xlu0 %245 }
 0x186   : > { %v256_v29 = vmul.f32 0.03125, %v246_v28  ;;  %v1010_v28 = vmov 0  }
 0x187   : > { %815 = vset.pattern.permute.xlu0 %v1010_v28  ;;  %816 = vset.pattern.permute.xlu1 %v1010_v28 }
 0x188   : > { %v260_v30 = vadd.f32 1e-05, %v256_v29 }
 0x189   : > { %v249_v31 = vpop.xlane.xlu1 %248  ;;  %v252_v32 = vpop.xlane.xlu0 %251 }
 0x18a   : > { %831 = vrsqrt.f32 %v260_v30  ;;  %v257_v33 = vmul.f32 0.03125, %v249_v31  ;;  %v258_v34 = vmul.f32 0.03125, %v252_v32 }
 0x18c   : > { %v261_v35 = vadd.f32 1e-05, %v257_v33  ;;  %v262_v36 = vadd.f32 1e-05, %v258_v34 }
 0x18d   : > { %v255_v37 = vpop.xlane.xlu1 %254 }
 0x18e   : > { %833 = vrsqrt.f32 %v261_v35  ;;  %v259_v38 = vmul.f32 0.03125, %v255_v37 }
 0x18f   : > { %835 = vrsqrt.f32 %v262_v36 }
 0x190   : > { %v263_v39 = vadd.f32 1e-05, %v259_v38 }
 0x192   : > { %837 = vrsqrt.f32 %v263_v39 }
 0x194   : > { %v832_v40 = vpop.eup %831 }
 0x195   : > { %v268_v42 = vmul.f32 %v832_v40, %v236_v12 }
 0x197   : > { %v273_v46 = vmul.f32 %v272_v43, %v268_v42  ;;  %v517_v52 = vmul.f32 0.5, %v268_v42 }
 0x198   : > { %v834_v44 = vpop.eup %833 }
 0x199   : > { %v836_v47 = vpop.eup %835  ;;  %v269_v49 = vmul.f32 %v834_v44, %v237_v20  ;;  %v282_v57 = vsel %vm218_vm0, %v273_v46, %v278_v45 }
 0x19a   : > { %v270_v50 = vmul.f32 %v836_v47, %v238_v13  ;;  %v293_v13 = vunpack.c.h.bf16 %v1245_v8 }
 0x19b   : > { %v274_v51 = vmul.f32 %v272_v43, %v269_v49  ;;  %v518_v53 = vmul.f32 0.5, %v269_v49  ;;  %v1011_v49 = vmov 839922192  }
 0x19c   : > { %v838_v54 = vpop.eup %837  ;;  %v275_v61 = vmul.f32 %v272_v43, %v270_v50  ;;  %v519_v0 = vmul.f32 0.5, %v270_v50  ;;  %v414_v50 = vunpack.c.l.s4 %v1011_v49 }
 0x19d   : > { %v521_v58 = vpack.c.bf16 %v518_v53, %v517_v52  ;;  %v283_v59 = vsel %vm218_vm0, %v274_v51, %v279_v48  ;;  %v271_v60 = vmul.f32 %v838_v54, %v239_v21  ;;  %v416_v51 = vlaneseq }
 0x19e   : > { %v286_v62 = vpack.c.bf16 %v283_v59, %v282_v57  ;;  %v284_v4 = vsel %vm218_vm0, %v275_v61, %v280_v55  ;;  %v415_v53 = vunpack.c.0.s8 %v414_v50 }
 0x19f   : > { %742 = vmatprep.subr.bf16.mxu1 %v521_v58  ;;  %v276_v63 = vmul.f32 %v272_v43, %v271_v60  ;;  %v520_v2 = vmul.f32 0.5, %v271_v60  ;;  %v417_v54 = vshrl.u32 %v416_v51, 7 }
 0x1a0   : > { %750 = vmatprep.subr.msk.bf16.mxu0 %vm296_vm1, %v286_v62  ;;  %738 = vmatprep.mubr.msk.bf16.mxu0 %vm296_vm1, %v286_v62  ;;  %v298_v1 = vsel %vm296_vm1, %v286_v62, 0 }
 0x1a1   : > { %743 = vmatpush3.bf16.msra.mxu1 %v521_v58  ;;  %735 = vmatpush3.bf16.xpose.msra.mxu0 %v298_v1  ;;  %v522_v3 = vpack.c.bf16 %v520_v2, %v519_v0  ;;  %v285_v5 = vsel %vm218_vm0, %v276_v63, %v281_v56  ;;  %v418_v57 = vsub.s32 %v415_v53, %v417_v54  ;;  %v1012_v58 = vmov 1985246804  }
 0x1a2   : > { %v287_v6 = vpack.c.bf16 %v285_v5, %v284_v4  ;;  %v421_v59 = vunpack.c.l.s4 %v1012_v58 }
 0x1a3   : > { %744 = vmatprep.subr.bf16.mxu1 %v522_v3 }
 0x1a4   : > { %751 = vmatprep.subr.msk.bf16.mxu0 %vm296_vm1, %v287_v6  ;;  %v301_v7 = vsel %vm296_vm1, %v287_v6, 0  ;;  %v422_v61 = vunpack.c.0.s8 %v421_v59 }
 0x1a5   : > { %745 = vmatpush3.bf16.msra.mxu1 %v522_v3 }
 0x1a6   : > { %v425_v63 = vsub.s32 %v422_v61, %v417_v54 }
 0x1a9   : > { %737 = vmatpush3.bf16.xpose.msra.mxu0 %v301_v7 }
 0x1b0   : > { %739 = vmatmul.mubr.msk.bf16.vlgmr.msra.gmra.mrb[0].mxu0 %vm296_vm1, %v287_v6 }
 0x283   : > { %v740_v12 = vpop.f32.mrb[0].mxu0 }
 0x284   : > { %v337_v14 = vpop.f32.mrb[1].mxu0  ;;  %v346_v19 = vadd.f32 %v740_v12, %v294_v11 }
 0x285   : > { %v338_v15 = vadd.f32 %v337_v14, %v292_v10  ;;  %v741_v17 = vpop.f32.mrb[2].mxu0 }
 0x286   : > { %v340_v18 = vpop.f32.mrb[3].mxu0  ;;  %v349_v22 = vadd.f32 %v741_v17, %v295_v16  ;;  %v358_v24 = vsel %vm218_vm0, %v346_v19, -inf }
 0x287   : > { %v341_v20 = vadd.f32 %v340_v18, %v293_v13  ;;  %v352_v21 = vsel %vm218_vm0, %v338_v15, -inf  ;;  %v1013_v18 = vmov 0.0  }
 0x288   : > { %353 = vmax.xlane.f32.xlu0 %v352_v21  ;;  %v361_v25 = vsel %vm218_vm0, %v349_v22, -inf }
 0x289   : > { %v355_v23 = vsel %vm218_vm0, %v341_v20, -inf }
 0x28a   : > { %356 = vmax.xlane.f32.xlu1 %v355_v23 }
 0x28c   : > { %359 = vmax.xlane.f32.xlu0 %v358_v24 }
 0x28e   : > { %362 = vmax.xlane.f32.xlu1 %v361_v25 }
 0x290   : > { %402 = vmax.xlane.bf16.xlu0 %v400_v27 }
 0x292   : > { %407 = vmax.xlane.bf16.xlu1 %v405_v26 }
 0x315   : > { %v354_v29 = vpop.xlane.xlu0 %353 }
 0x316   : > { %v364_v30 = vsub.f32 %v338_v15, %v354_v29 }
 0x317   : > { %v357_v31 = vpop.xlane.xlu1 %356 }
 0x318   : > { %v368_v32 = vmul.f32 1.442695, %v364_v30  ;;  %v365_v33 = vsub.f32 %v341_v20, %v357_v31 }
 0x319   : > { %v360_v34 = vpop.xlane.xlu0 %359 }
 0x31a   : > { %839 = vpow2.f32 %v368_v32  ;;  %v370_v35 = vmul.f32 1.442695, %v365_v33  ;;  %v366_v36 = vsub.f32 %v346_v19, %v360_v34 }
 0x31b   : > { %v363_v37 = vpop.xlane.xlu1 %362 }
 0x31c   : > { %841 = vpow2.f32 %v370_v35  ;;  %v372_v38 = vmul.f32 1.442695, %v366_v36  ;;  %v367_v39 = vsub.f32 %v349_v22, %v363_v37  ;;  %v822_v35 = vpack.i.bf16 %v295_v16, %v294_v11 }
 0x31e   : > { %843 = vpow2.f32 %v372_v38  ;;  %v374_v40 = vmul.f32 1.442695, %v367_v39 }
 0x320   : > { %845 = vpow2.f32 %v374_v40 }
 0x321   : > { %v403_v52 = vpop.xlane.xlu0 %402 }
 0x322   : > { %vm409_vm2 = vcmp.gt.bf16.partialorder %v403_v52, 3212885888 }
 0x323   : > { %v408_v55 = vpop.xlane.xlu1 %407  ;;  %v411_v56 = vsel %vm409_vm2, 65537, %v1010_v28 }
 0x324   : > { %v1272_v41 = vpop.eup %839  ;;  %vm410_vm3 = vcmp.gt.bf16.partialorder %v408_v55, 3212885888  ;;  %v419_v60 = vrot.slane %v411_v56, %v418_v57  ;;  %v426_v1 = vrot.slane %v411_v56, %v425_v63 }
 0x325   : > { %v376_v42 = vsel %vm218_vm0, %v1272_v41, 0.0  ;;  %v412_v62 = vsel %vm410_vm3, 65537, %v1010_v28 }
 0x326   : > { %v1276_v43 = vpop.eup %841  ;;  %377 = vadd.xlane.f32.xlu1 %v376_v42  ;;  %vm441_vm4 = vcmp.ne.s16.totalorder %v419_v60, 0  ;;  %v433_v0 = vrot.slane %v412_v62, %v418_v57  ;;  %vm442_vm6 = vcmp.ne.s16.totalorder %v426_v1, 0  ;;  %v440_v12 = vrot.slane %v412_v62, %v425_v63 }
 0x327   : > { %v379_v44 = vsel %vm218_vm0, %v1276_v43, 0.0  ;;  %v445_v2 = vsel %vm441_vm4, 65537, %v1010_v28  ;;  %v446_v14 = vsel %vm442_vm6, 65537, %v1010_v28 }
 0x328   : > { %v1280_v45 = vpop.eup %843  ;;  %380 = vadd.xlane.f32.xlu0 %v379_v44  ;;  %vm443_vm5 = vcmp.ne.s16.totalorder %v433_v0, 0  ;;  %v449_v4 = vunpack.c.l.b16 %v445_v2  ;;  %vm444_vm8 = vcmp.ne.s16.totalorder %v440_v12, 0  ;;  %v450_v20 = vunpack.c.l.b16 %v446_v14 }
 0x329   : > { %v382_v46 = vsel %vm218_vm0, %v1280_v45, 0.0  ;;  %v447_v7 = vsel %vm443_vm5, 65537, %v1010_v28  ;;  %v448_v23 = vsel %vm444_vm8, 65537, %v1010_v28  ;;  %v817_v28 = vpack.i.bf16 %v293_v13, %v292_v10 }
 0x32a   : > { %v1284_v47 = vpop.eup %845  ;;  %383 = vadd.xlane.f32.xlu1 %v382_v46  ;;  %vm453_vm7 = vcmp.ne.s32.totalorder %v449_v4, 0  ;;  %v451_v15 = vunpack.c.l.b16 %v447_v7  ;;  %vm454_vm10 = vcmp.ne.s32.totalorder %v450_v20, 0  ;;  %v452_v26 = vunpack.c.l.b16 %v448_v23 }
 0x32b   : > { %v385_v48 = vsel %vm218_vm0, %v1284_v47, 0.0  ;;  %v712_v19 = vsel %vm453_vm7, 1.0, %v1013_v18  ;;  %v713_v30 = vsel %vm454_vm10, 1.0, %v1013_v18 }
 0x32c   : > { %386 = vadd.xlane.f32.xlu0 %v385_v48  ;;  %vm455_vm9 = vcmp.ne.s32.totalorder %v451_v15, 0  ;;  %vm456_vm11 = vcmp.ne.s32.totalorder %v452_v26, 0 }
 0x32d   : > { %v714_v25 = vsel %vm455_vm9, 1.0, %v1013_v18  ;;  %v715_v33 = vsel %vm456_vm11, 1.0, %v1013_v18 }
 0x3b3   : > { %v378_v3 = vpop.xlane.xlu1 %377 }
 0x3b4   : > { %847 = vrcp.f32 %v378_v3 }
 0x3b5   : > { %v381_v5 = vpop.xlane.xlu0 %380 }
 0x3b7   : > { %v384_v6 = vpop.xlane.xlu1 %383 }
 0x3b8   : > { %849 = vrcp.f32 %v384_v6 }
 0x3b9   : > { %851 = vrcp.f32 %v381_v5  ;;  %v387_v17 = vpop.xlane.xlu0 %386 }
 0x3ba   : > { %853 = vrcp.f32 %v387_v17 }
 0x3be   : > { %v848_v21 = vpop.eup %847 }
 0x3bf   : > { %v469_v22 = vmul.f32 %v848_v21, %v712_v19 }
 0x3c1   : > { %475 = vperm.xlu0 %815, %v469_v22  }
 0x3c2   : > { %v850_v24 = vpop.eup %849 }
 0x3c3   : > { %v471_v27 = vmul.f32 %v850_v24, %v714_v25  ;;  %v852_v29 = vpop.eup %851 }
 0x3c4   : > { %v470_v31 = vmul.f32 %v852_v29, %v713_v30  ;;  %v854_v32 = vpop.eup %853 }
 0x3c5   : > { %485 = vperm.xlu1 %816, %v471_v27   ;;  %v472_v34 = vmul.f32 %v854_v32, %v715_v33 }
 0x3c9   : > { %480 = vperm.xlu1 %816, %v470_v31  }
 0x3cd   : > { %490 = vperm.xlu1 %816, %v472_v34  }
 0x3d1   : > { %818 = vrot.lane.b32.xlu1 %v817_v28, %s1014_s29 }
 0x3d5   : > { %823 = vrot.lane.b32.xlu1 %v822_v35, %s1014_s29 }
 0x440   : > { %v476_v39 = vpop.permute.xlu0 %475 }
 0x441   : > { %v493_v42 = vmul.f32 %v1272_v41, %v476_v39 }
 0x444   : > { %v486_v36 = vpop.permute.xlu1 %485 }
 0x445   : > { %v495_v44 = vmul.f32 %v1280_v45, %v486_v36 }
 0x448   : > { %v481_v37 = vpop.permute.xlu1 %480 }
 0x449   : > { %v494_v8 = vmul.f32 %v1276_v43, %v481_v37 }
 0x44c   : > { %v491_v38 = vpop.permute.xlu1 %490 }
 0x44d   : > { %v496_v9 = vmul.f32 %v1284_v47, %v491_v38 }
 0x450   : > { %v819_v40 = vpop.permute.xlu1 %818 }
 0x451   : > { %v855_v10 = vadd.low.f32.bf16 %v493_v42, %v819_v40  ;;  %v856_v13 = vadd.high.f32.bf16 %v494_v8, %v819_v40 }
 0x453   : > { %v523_v11 = vpack.c.bf16 %v856_v13, %v855_v10 }
 0x454   : > { %v824_v46 = vpop.permute.xlu1 %823 }
 0x455   : > { %v857_v16 = vadd.high.f32.bf16 %v496_v9, %v824_v46  ;;  %v858_v48 = vadd.low.f32.bf16 %v495_v44, %v824_v46  ;;  %746 = vmatprep.mubr.msk.bf16.mxu1 %vm218_vm0, %v523_v11 }
 0x457   : > { %v524_v49 = vpack.c.bf16 %v857_v16, %v858_v48 }
 0x459   : > { %747 = vmatmul.mubr.msk.bf16.vlgmr.msra.gmra.mrb[0].mxu1 %vm218_vm0, %v524_v49 }
 0x52c   : > { %v748_v41 = vpop.f32.mrb[0].mxu1 }
 0x52d   : > { %582 = vst.msk [vmem:[%s206_s13 + $0x10] sm:$0xff] %vm218_vm0, %v748_v41  ;;  %v565_v43 = vpop.f32.mrb[1].mxu1 }
 0x52e   : > { %580 = vst.msk [vmem:[%s206_s13] sm:$0xff] %vm218_vm0, %v565_v43  ;;  %v749_v45 = vpop.f32.mrb[2].mxu1 }
 0x52f   : > { %583 = vst.msk [vmem:[%s206_s13 + $0x18] sm:$0xff] %vm218_vm0, %v749_v45  ;;  %v568_v47 = vpop.f32.mrb[3].mxu1 }
 0x530   : > { %581 = vst.msk [vmem:[%s206_s13 + $0x8] sm:$0xff] %vm218_vm0, %v568_v47 }
 0x531   : > { %942 = shalt.err (!%p939_p6)
}
 0x532   : > { %s943_s4 = scalar_lea.hbm %s1317_s19, 512  ;;  %s947_s16 = scalar_lea.hbm %s1367_s3, 1024 }
 0x533   : > { %p944_p1 = scmp.ne.s32.totalorder %s1317_s19, %s943_s4  ;;  %p948_p5 = scmp.lt.u32.totalorder %s1317_s19, %s1367_s3 }
 0x534   : > { %p949_p7 = scmp.lt.u32.totalorder %s947_s16, %s943_s4  ;;  %p951_p2 = scmp.lt.u32.totalorder %s943_s4, %s1317_s19 }
 0x535   : > { %p945_p11 = pnand %p944_p1, %p1377_p4 }
 0x536   : > { %p950_p9 = por %p949_p7, %p948_p5 }
 0x537   : > { %p946_p3 = pneg %p945_p11 }
 0x538   : > { %p952_p0 = por %p951_p2, %p950_p9 }
 0x53a   : > { %p953_p13 = pnand %p952_p0, %p946_p3 }
 0x53c   : > { %956 = shalt.err (!%p953_p13)
}
 0x53d   : > { %s1016_s21 = smov 128   ;;  %s1017_s29 = smov 8  }
 0x53e   : > { %756 = dma.vmem_to_hbm [thread:$0]  (%p1377_p4), %s1311_s10, 512, %s1317_s19, %s585_s0, %s1016_s21, %s1016_s21, %s1017_s29  }
 0x53f PF: > { %s613_s13 = sand.u32 1, %s989_s22   ;;  %p1378_p8 = scmp.ne.s32.totalorder %s1373_s7, 0 }
 0x540   : > { %p1379_p10 = scmp.ge.s32.totalorder %s1001_s25, 2  ;;  %s614_s11 = scalar_lea.sflag [#allocation6], %s613_s13 }
 0x542   : > { %p766_p12 = pnand %p1379_p10, %p1378_p8 }
 0x544   : > { %984 = dma.done.wait (!%p766_p12), %s614_s11, 512  }
 0x545   : > { %986 = vsyncadd (!%p766_p12), %s614_s11, 4294966784  ;;  %p23_p6 = scmp.ge.s32.totalorder %s1075_s27, 4   ;;  %s1380_s22 = smov %s993_s23 }
 0x546   : > { %s1381_s23 = smov %s997_s24  ;;  %s1382_s24 = smov %s1087_s30 }
 0x547   : > { %s1383_s25 = smov %s1075_s27  ;;  %25 = sbr.rel (!%p23_p6) target bundleno = 19 (0x13), region = 86 }
 0x54e   :  { %619 = vsyncpa [#allocation5], 1 }
 0x54f   :  { %621 = vsyncpa [#allocation5 + $0x1], 1 }
 0x550   :  { %622 = vsyncpa [#allocation8], 1 }
 0x551   :  { %624 = vsyncpa [#allocation8 + $0x1], 1 }
 0x552   :  { %625 = vsyncpa [#allocation6], 1 }
 0x553   :  { %627 = vsyncpa [#allocation6 + $0x1], 1 }

</bundles_post_ra>
